<compile_context>
chip_gen: v7x
topology: tpu7x:2x2x1
jax: 0.10.0
libtpu: 0.0.40
codegen_flags: <defaults>
</compile_context>

<pallas_src>
import math

import jax
import jax.numpy as jnp
from jax.experimental import pallas as pl
from jax.experimental.pallas import tpu as pltpu

_MIB = 1024 * 1024


# ---------------------------------------------------------------------------
# Kernel
# ---------------------------------------------------------------------------
def two_mlp_head_kernel(x_ref, w6_ref, b6_ref, w7_ref, b7_ref, o_ref, acc_ref):
    # x_ref:  (TM, TK)     flattened ROI-feature tile (M tile, K slab)
    # w6_ref: (TK, REP)    fc6 weight K-slab (transposed vs torch)
    # b6_ref: (1, REP)     fc6 bias (f32)
    # w7_ref: (REP, REP)   fc7 weight (transposed vs torch), grid-invariant
    # b7_ref: (1, REP)     fc7 bias (f32)
    # o_ref:  (TM, REP)
    # acc_ref:(TM, REP)    f32 accumulator / fc6 intermediate (VMEM scratch)
    k = pl.program_id(1)

    @pl.when(k == 0)
    def _init():
        acc_ref[...] = jnp.zeros_like(acc_ref)

    # fc6 partial matmul on the MXU, f32 accumulation resident in VMEM.
    acc_ref[...] += jnp.dot(x_ref[...], w6_ref[...],
                            preferred_element_type=jnp.float32)

    @pl.when(k == pl.num_programs(1) - 1)
    def _finalize():
        # bias + ReLU on the accumulated fc6 output (never leaves VMEM).
        h = jnp.maximum(acc_ref[...] + b6_ref[...], 0.0)
        # fc7 + bias + ReLU fused on the last K step.
        y = jnp.dot(h.astype(w7_ref.dtype), w7_ref[...],
                    preferred_element_type=jnp.float32)
        o_ref[...] = jnp.maximum(y + b7_ref[...], 0.0).astype(o_ref.dtype)


# ---------------------------------------------------------------------------
# Helpers
# ---------------------------------------------------------------------------
def _round_up(x, m):
    return ((x + m - 1) // m) * m


def _vmem_capacity_bytes():
    """Physical VMEM of the local chip; conservative (v7x-sized) fallback."""
    try:
        cap = getattr(pltpu.get_tpu_info(), "vmem_capacity_bytes", None)
        if cap:
            return int(cap)
    except Exception:
        pass
    return 64 * _MIB


def _select_tiles(n, k_pad, rep, in_itemsize, out_itemsize,
                  tile_m_max, tile_k_max, vmem_budget, min_m_tiles):
    """Pick (tile_m, tile_k): big M tiles (fc6-weight reuse), tile_k a divisor
    of the 128-aligned in_features, both shrunk to fit the VMEM budget."""
    n8 = _round_up(max(n, 8), 8)
    tile_m = min(tile_m_max, n8)
    if min_m_tiles >= 2 and n8 >= 16:
        # Keep at least 2 M tiles so both TensorCores get work (v7x megacore).
        tile_m = min(tile_m, _round_up((n8 + 1) // 2, 8))
    tile_m = _round_up(tile_m, 8)

    nblk = k_pad // 128
    k_cands = [d * 128 for d in range(1, nblk + 1)
               if nblk % d == 0 and d * 128 <= tile_k_max]
    if not k_cands:
        k_cands = [128]
    ki = len(k_cands) - 1  # start with the largest candidate

    def est(tm, tk):
        return (2 * tm * tk * in_itemsize       # x tile (double-buffered)
                + 2 * tk * rep * in_itemsize    # w6 slab (double-buffered)
                + rep * rep * in_itemsize       # w7 (single-buffered, invariant)
                + 2 * tm * rep * out_itemsize   # output tile
                + tm * rep * 4                  # f32 accumulator scratch
                + 2 * tm * rep * 4)             # finalize temporaries (h, y)

    while est(tile_m, k_cands[ki]) > vmem_budget:
        if ki > 0:
            ki -= 1
        elif tile_m > 16:
            tile_m = _round_up(tile_m // 2, 8)
        else:
            break
    return tile_m, k_cands[ki]


# ---------------------------------------------------------------------------
# Weight preparation (hoist out of the forward path; do once at model load)
# ---------------------------------------------------------------------------
def prepare_two_mlp_head_params(w6, b6, w7, b7, *, param_dtype=None):
    """Transpose / cast / K-pad the weights once (torch nn.Linear layout in)."""
    rep, in_features = w6.shape
    dt = param_dtype if param_dtype is not None else w6.dtype
    k_pad = in_features if in_features % 128 == 0 else _round_up(in_features, 128)

    w6_t = w6.T.astype(dt)                                   # (IN, REP)
    if k_pad != in_features:
        w6_t = jnp.pad(w6_t, ((0, k_pad - in_features), (0, 0)))
    w7_t = w7.T.astype(dt)                                   # (REP, REP)
    b6_2d = b6.reshape(1, rep).astype(jnp.float32)
    b7_2d = b7.reshape(1, rep).astype(jnp.float32)
    return dict(w6_t=w6_t, b6=b6_2d, w7_t=w7_t, b7=b7_2d,
                in_features=in_features, k_pad=k_pad, rep=rep, dtype=dt)


# ---------------------------------------------------------------------------
# Forward
# ---------------------------------------------------------------------------
def two_mlp_head_from_params(x_nchw, params, *, tile_m_max=1024, tile_k_max=2048,
                             max_rois=None, interpret=False):
    """TwoMLPHead forward from pre-prepared params.

    x_nchw: (N, C, H, W) ROI-pooled features; output keeps x's dtype.
    max_rois: optional static batch bucket (e.g. max post-NMS proposals) so the
              grid — and therefore the compiled kernel — stays fixed.
    """
    n = x_nchw.shape[0]
    in_features = math.prod(x_nchw.shape[1:])
    assert in_features == params["in_features"], "x does not match fc6 weights"
    rep = params["rep"]
    k_pad = params["k_pad"]
    compute_dtype = params["dtype"]
    out_dtype = x_nchw.dtype

    in_itemsize = jnp.dtype(compute_dtype).itemsize
    out_itemsize = jnp.dtype(out_dtype).itemsize

    # Generation-conditional VMEM budget / megacore rule.
    cap = _vmem_capacity_bytes()
    if cap >= 100 * _MIB:            # v5e / v6e: 128 MiB physical VMEM
        vmem_limit = 100 * _MIB
        min_m_tiles = 1              # single M tile maximizes fc6-weight reuse
    else:                            # v7x: 64 MiB physical VMEM, 2 TensorCores
        vmem_limit = 48 * _MIB
        min_m_tiles = 2              # keep both TCs busy on the parallel axis

    tile_m, tile_k = _select_tiles(n, k_pad, rep, in_itemsize, out_itemsize,
                                   tile_m_max, tile_k_max,
                                   vmem_limit - 4 * _MIB, min_m_tiles)

    # Batch padding (zero rows contribute nothing; they are sliced off below).
    n_target = max(n, max_rois) if max_rois is not None else n
    n_pad = _round_up(max(n_target, tile_m), tile_m)

    # Glue: flatten NCHW -> (N, C*H*W) (row-major == torch.flatten(1)), cast, pad.
    x2d = x_nchw.reshape(n, in_features).astype(compute_dtype)
    if n_pad != n or k_pad != in_features:
        x2d = jnp.pad(x2d, ((0, n_pad - n), (0, k_pad - in_features)))

    num_m_tiles = n_pad // tile_m
    grid = (num_m_tiles, k_pad // tile_k)      # K (reduction) axis is last.

    flops = 2 * n_pad * (k_pad * rep + rep * rep)
    bytes_accessed = (n_pad * k_pad * in_itemsize                  # x (padded)
                      + num_m_tiles * k_pad * rep * in_itemsize    # w6 per M tile
                      + rep * rep * in_itemsize                    # w7 (once)
                      + 2 * rep * 4                                # biases
                      + n_pad * rep * out_itemsize)                # output

    def _call(use_buffered_invariant):
        inv = dict(pipeline_mode=pl.Buffered(1)) if use_buffered_invariant else {}
        return pl.pallas_call(
            two_mlp_head_kernel,
            out_shape=jax.ShapeDtypeStruct((n_pad, rep), out_dtype),
            grid_spec=pltpu.PrefetchScalarGridSpec(
                num_scalar_prefetch=0,
                grid=grid,
                in_specs=[
                    pl.BlockSpec((tile_m, tile_k), lambda i, k: (i, k)),  # x tile
                    pl.BlockSpec((tile_k, rep), lambda i, k: (k, 0)),     # w6^T slab
                    pl.BlockSpec((1, rep), lambda i, k: (0, 0), **inv),   # b6
                    pl.BlockSpec((rep, rep), lambda i, k: (0, 0), **inv), # w7^T
                    pl.BlockSpec((1, rep), lambda i, k: (0, 0), **inv),   # b7
                ],
                out_specs=pl.BlockSpec((tile_m, rep), lambda i, k: (i, 0)),
                scratch_shapes=[pltpu.VMEM((tile_m, rep), jnp.float32)],
            ),
            compiler_params=pltpu.CompilerParams(
                dimension_semantics=("parallel", "arbitrary"),
                vmem_limit_bytes=vmem_limit,
            ),
            cost_estimate=pl.CostEstimate(
                flops=flops, transcendentals=0, bytes_accessed=bytes_accessed),
            interpret=interpret,
        )(x2d, params["w6_t"], params["b6"], params["w7_t"], params["b7"])

    try:
        out = _call(True)
    except Exception:
        # Fallback if this JAX build rejects single-buffered pipeline_mode.
        out = _call(False)

    return out[:n] if n_pad != n else out


def two_mlp_head(x_nchw, w6, b6, w7, b7, *, param_dtype=None, **kwargs):
    """Convenience wrapper (torch nn.Linear weight layout).

    NOTE: for serving, call prepare_two_mlp_head_params() once at model load
    and use two_mlp_head_from_params(); this wrapper re-preps weights per call.
    """
    params = prepare_two_mlp_head_params(
        w6, b6, w7, b7,
        param_dtype=param_dtype if param_dtype is not None else x_nchw.dtype)
    return two_mlp_head_from_params(x_nchw, params, **kwargs)


# ---------------------------------------------------------------------------
# Reference + demo
# ---------------------------------------------------------------------------
def reference(x_nchw, w6, b6, w7, b7):
    x = x_nchw.reshape(x_nchw.shape[0], -1)
    h = jnp.maximum(x @ w6.T + b6, 0.0)
    return jnp.maximum(h @ w7.T + b7, 0.0)


if __name__ == "__main__":
    # Small shapes consistent with the module: ROI features (N, C, H, W),
    # in_channels = C*H*W, representation_size = REP.  Ragged N exercises the
    # batch-padding / multi-M-tile path; REP is a multiple of 128 (lane-dense).
    N, C, H, W = 19, 4, 8, 8
    IN = C * H * W          # 256
    REP = 128

    key = jax.random.PRNGKey(0)
    k_x, k_w6, k_b6, k_w7, k_b7 = jax.random.split(key, 5)

    x = jax.random.normal(k_x, (N, C, H, W), dtype=jnp.float32)
    w6 = jax.random.normal(k_w6, (REP, IN), dtype=jnp.float32) * 0.05
    b6 = jax.random.normal(k_b6, (REP,), dtype=jnp.float32) * 0.01
    w7 = jax.random.normal(k_w7, (REP, REP), dtype=jnp.float32) * 0.05
    b7 = jax.random.normal(k_b7, (REP,), dtype=jnp.float32) * 0.01

    ref = reference(x, w6, b6, w7, b7)

    # f32 path: weights prepared once (hoisted), then the kernel is called.
    params_f32 = prepare_two_mlp_head_params(w6, b6, w7, b7,
                                             param_dtype=jnp.float32)
    out = jax.block_until_ready(two_mlp_head_from_params(x, params_f32))
    assert out.shape == (N, REP)
    assert jnp.allclose(out, ref, atol=1e-4, rtol=1e-4), "f32 mismatch vs reference"

    # bf16 weights/activations (f32 accumulation): halves the dominant
    # fc6-weight HBM stream at full MXU rate; inference-style tolerance.
    out_bf16 = jax.block_until_ready(
        two_mlp_head(x, w6, b6, w7, b7, param_dtype=jnp.bfloat16))
    assert out_bf16.shape == (N, REP)
    assert jnp.allclose(out_bf16.astype(jnp.float32), ref, atol=5e-2, rtol=5e-2), \
        "bf16 mismatch vs reference"

    print("KERNEL_OK")
</pallas_src>

<mosaic_0001>
module attributes {stable_mosaic.version = 11 : i64} {
  func.func @two_mlp_head_kernel(%arg0: i32, %arg1: i32, %arg2: memref<16x256xf32, #tpu.memory_space<vmem>>, %arg3: memref<256x128xf32, #tpu.memory_space<vmem>>, %arg4: memref<1x128xf32, #tpu.memory_space<vmem>>, %arg5: memref<128x128xf32, #tpu.memory_space<vmem>>, %arg6: memref<1x128xf32, #tpu.memory_space<vmem>>, %arg7: memref<16x128xf32, #tpu.memory_space<vmem>>, %arg8: memref<16x128xf32, #tpu.memory_space<vmem>>) attributes {dimension_semantics = [#tpu.dimension_semantics<parallel>, #tpu.dimension_semantics<arbitrary>], iteration_bounds = array<i64: 2, 1>, scalar_prefetch = 0 : i64, scratch_operands = 1 : i64, tpu.core_type = #tpu.core_type<tc>, window_params = [{transform_indices = @transform_0, window_bounds = array<i64: 16, 256>}, {transform_indices = @transform_1, window_bounds = array<i64: 256, 128>}, {pipeline_mode = #tpu.pipeline_mode<synchronous>, transform_indices = @transform_2, window_bounds = array<i64: 1, 128>}, {pipeline_mode = #tpu.pipeline_mode<synchronous>, transform_indices = @transform_3, window_bounds = array<i64: 128, 128>}, {pipeline_mode = #tpu.pipeline_mode<synchronous>, transform_indices = @transform_4, window_bounds = array<i64: 1, 128>}, {transform_indices = @transform_5, window_bounds = array<i64: 16, 128>}]} {
    %c0_i32 = arith.constant 0 : i32
    %0 = arith.cmpi eq, %arg1, %c0_i32 : i32
    %1 = arith.extui %0 : i1 to i32
    %c0_i32_0 = arith.constant 0 : i32
    %2 = arith.cmpi ne, %1, %c0_i32_0 : i32
    scf.if %2 {
      %cst_10 = arith.constant 0.000000e+00 : f32
      %12 = vector.broadcast %cst_10 : f32 to vector<16x128xf32>
      %c0_11 = arith.constant 0 : index
      %c0_12 = arith.constant 0 : index
      %13 = vector.load %arg8[%c0_11, %c0_12] : memref<16x128xf32, #tpu.memory_space<vmem>>, vector<16x128xf32>
      tpu.vector_store %arg8[%c0_11, %c0_12], %12 {strides = array<i32>} : memref<16x128xf32, #tpu.memory_space<vmem>>, vector<16x128xf32>,
    } else {
    }
    %c0 = arith.constant 0 : index
    %c0_1 = arith.constant 0 : index
    %3 = vector.load %arg8[%c0, %c0_1] : memref<16x128xf32, #tpu.memory_space<vmem>>, vector<16x128xf32>
    %c0_2 = arith.constant 0 : index
    %c0_3 = arith.constant 0 : index
    %4 = vector.load %arg2[%c0_2, %c0_3] : memref<16x256xf32, #tpu.memory_space<vmem>>, vector<16x256xf32>
    %c0_4 = arith.constant 0 : index
    %c0_5 = arith.constant 0 : index
    %5 = vector.load %arg3[%c0_4, %c0_5] : memref<256x128xf32, #tpu.memory_space<vmem>>, vector<256x128xf32>
    %cst = arith.constant dense<0.000000e+00> : vector<16x128xf32>
    %6 = tpu.matmul %4, %5, %cst {dimension_numbers = #tpu.dot_dimension_numbers<[1], [0], [0], [1], [0, 0, 1, 1], [], []>} : vector<16x256xf32>, vector<256x128xf32>, vector<16x128xf32> -> vector<16x128xf32>
    %7 = arith.addf %3, %6 : vector<16x128xf32>
    %c0_6 = arith.constant 0 : index
    %c0_7 = arith.constant 0 : index
    %8 = vector.load %arg8[%c0_6, %c0_7] : memref<16x128xf32, #tpu.memory_space<vmem>>, vector<16x128xf32>
    tpu.vector_store %arg8[%c0_6, %c0_7], %7 {strides = array<i32>} : memref<16x128xf32, #tpu.memory_space<vmem>>, vector<16x128xf32>,
    %c0_i32_8 = arith.constant 0 : i32
    %9 = arith.cmpi eq, %arg1, %c0_i32_8 : i32
    %10 = arith.extui %9 : i1 to i32
    %c0_i32_9 = arith.constant 0 : i32
    %11 = arith.cmpi ne, %10, %c0_i32_9 : i32
    scf.if %11 {
      %c0_10 = arith.constant 0 : index
      %c0_11 = arith.constant 0 : index
      %12 = vector.load %arg8[%c0_10, %c0_11] : memref<16x128xf32, #tpu.memory_space<vmem>>, vector<16x128xf32>
      %c0_12 = arith.constant 0 : index
      %c0_13 = arith.constant 0 : index
      %13 = vector.load %arg4[%c0_12, %c0_13] : memref<1x128xf32, #tpu.memory_space<vmem>>, vector<1x128xf32>
      %14 = vector.broadcast %13 : vector<1x128xf32> to vector<16x128xf32>
      %15 = arith.addf %12, %14 : vector<16x128xf32>
      %cst_14 = arith.constant 0.000000e+00 : f32
      %16 = vector.broadcast %cst_14 : f32 to vector<16x128xf32>
      %17 = arith.maximumf %15, %16 : vector<16x128xf32>
      %c0_15 = arith.constant 0 : index
      %c0_16 = arith.constant 0 : index
      %18 = vector.load %arg5[%c0_15, %c0_16] : memref<128x128xf32, #tpu.memory_space<vmem>>, vector<128x128xf32>
      %cst_17 = arith.constant dense<0.000000e+00> : vector<16x128xf32>
      %19 = tpu.matmul %17, %18, %cst_17 {dimension_numbers = #tpu.dot_dimension_numbers<[1], [0], [0], [1], [0, 0, 1, 1], [], []>} : vector<16x128xf32>, vector<128x128xf32>, vector<16x128xf32> -> vector<16x128xf32>
      %c0_18 = arith.constant 0 : index
      %c0_19 = arith.constant 0 : index
      %20 = vector.load %arg6[%c0_18, %c0_19] : memref<1x128xf32, #tpu.memory_space<vmem>>, vector<1x128xf32>
      %21 = vector.broadcast %20 : vector<1x128xf32> to vector<16x128xf32>
      %22 = arith.addf %19, %21 : vector<16x128xf32>
      %cst_20 = arith.constant 0.000000e+00 : f32
      %23 = vector.broadcast %cst_20 : f32 to vector<16x128xf32>
      %24 = arith.maximumf %22, %23 : vector<16x128xf32>
      %c0_21 = arith.constant 0 : index
      %c0_22 = arith.constant 0 : index
      %25 = vector.load %arg7[%c0_21, %c0_22] : memref<16x128xf32, #tpu.memory_space<vmem>>, vector<16x128xf32>
      tpu.vector_store %arg7[%c0_21, %c0_22], %24 {strides = array<i32>} : memref<16x128xf32, #tpu.memory_space<vmem>>, vector<16x128xf32>,
    } else {
    }
    return
  }
  func.func @transform_0(%arg0: i32, %arg1: i32) -> (i32, i32) {
    %c0_i32 = arith.constant 0 : i32
    return %arg0, %arg1 : i32, i32
  }
  func.func @transform_1(%arg0: i32, %arg1: i32) -> (i32, i32) {
    %c0_i32 = arith.constant 0 : i32
    %c0_i32_0 = arith.constant 0 : i32
    return %arg1, %c0_i32 : i32, i32
  }
  func.func @transform_2(%arg0: i32, %arg1: i32) -> (i32, i32) {
    %c0_i32 = arith.constant 0 : i32
    %c0_i32_0 = arith.constant 0 : i32
    %c0_i32_1 = arith.constant 0 : i32
    return %c0_i32, %c0_i32_0 : i32, i32
  }
  func.func @transform_3(%arg0: i32, %arg1: i32) -> (i32, i32) {
    %c0_i32 = arith.constant 0 : i32
    %c0_i32_0 = arith.constant 0 : i32
    %c0_i32_1 = arith.constant 0 : i32
    return %c0_i32, %c0_i32_0 : i32, i32
  }
  func.func @transform_4(%arg0: i32, %arg1: i32) -> (i32, i32) {
    %c0_i32 = arith.constant 0 : i32
    %c0_i32_0 = arith.constant 0 : i32
    %c0_i32_1 = arith.constant 0 : i32
    return %c0_i32, %c0_i32_0 : i32, i32
  }
  func.func @transform_5(%arg0: i32, %arg1: i32) -> (i32, i32) {
    %c0_i32 = arith.constant 0 : i32
    %c0_i32_0 = arith.constant 0 : i32
    return %arg0, %c0_i32 : i32, i32
  }
}

module attributes {stable_mosaic.version = 11 : i64} {
  func.func @two_mlp_head_kernel(%arg0: i32, %arg1: i32, %arg2: memref<16x256xf32, #tpu.memory_space<vmem>>, %arg3: memref<256x128xf32, #tpu.memory_space<vmem>>, %arg4: memref<1x128xf32, #tpu.memory_space<vmem>>, %arg5: memref<128x128xf32, #tpu.memory_space<vmem>>, %arg6: memref<1x128xf32, #tpu.memory_space<vmem>>, %arg7: memref<16x128xf32, #tpu.memory_space<vmem>>, %arg8: memref<16x128xf32, #tpu.memory_space<vmem>>) attributes {dimension_semantics = [#tpu.dimension_semantics<parallel>, #tpu.dimension_semantics<arbitrary>], iteration_bounds = array<i64: 2, 1>, scalar_prefetch = 0 : i64, scratch_operands = 1 : i64, tpu.core_type = #tpu.core_type<tc>, window_params = [{transform_indices = @transform_0, window_bounds = array<i64: 16, 256>}, {transform_indices = @transform_1, window_bounds = array<i64: 256, 128>}, {pipeline_mode = #tpu.pipeline_mode<synchronous>, transform_indices = @transform_2, window_bounds = array<i64: 1, 128>}, {pipeline_mode = #tpu.pipeline_mode<synchronous>, transform_indices = @transform_3, window_bounds = array<i64: 128, 128>}, {pipeline_mode = #tpu.pipeline_mode<synchronous>, transform_indices = @transform_4, window_bounds = array<i64: 1, 128>}, {transform_indices = @transform_5, window_bounds = array<i64: 16, 128>}]} {
    %c0_i32 = arith.constant 0 : i32
    %0 = arith.cmpi eq, %arg1, %c0_i32 : i32
    %1 = arith.extui %0 : i1 to i32
    %c0_i32_0 = arith.constant 0 : i32
    %2 = arith.cmpi ne, %1, %c0_i32_0 : i32
    scf.if %2 {
      %cst_10 = arith.constant 0.000000e+00 : f32
      %12 = vector.broadcast %cst_10 : f32 to vector<16x128xf32>
      %c0_11 = arith.constant 0 : index
      %c0_12 = arith.constant 0 : index
      %13 = vector.load %arg8[%c0_11, %c0_12] : memref<16x128xf32, #tpu.memory_space<vmem>>, vector<16x128xf32>
      tpu.vector_store %arg8[%c0_11, %c0_12], %12 {strides = array<i32>} : memref<16x128xf32, #tpu.memory_space<vmem>>, vector<16x128xf32>,
    } else {
    }
    %c0 = arith.constant 0 : index
    %c0_1 = arith.constant 0 : index
    %3 = vector.load %arg8[%c0, %c0_1] : memref<16x128xf32, #tpu.memory_space<vmem>>, vector<16x128xf32>
    %c0_2 = arith.constant 0 : index
    %c0_3 = arith.constant 0 : index
    %4 = vector.load %arg2[%c0_2, %c0_3] : memref<16x256xf32, #tpu.memory_space<vmem>>, vector<16x256xf32>
    %c0_4 = arith.constant 0 : index
    %c0_5 = arith.constant 0 : index
    %5 = vector.load %arg3[%c0_4, %c0_5] : memref<256x128xf32, #tpu.memory_space<vmem>>, vector<256x128xf32>
    %cst = arith.constant dense<0.000000e+00> : vector<16x128xf32>
    %6 = tpu.matmul %4, %5, %cst {dimension_numbers = #tpu.dot_dimension_numbers<[1], [0], [0], [1], [0, 0, 1, 1], [], []>} : vector<16x256xf32>, vector<256x128xf32>, vector<16x128xf32> -> vector<16x128xf32>
    %7 = arith.addf %3, %6 : vector<16x128xf32>
    %c0_6 = arith.constant 0 : index
    %c0_7 = arith.constant 0 : index
    %8 = vector.load %arg8[%c0_6, %c0_7] : memref<16x128xf32, #tpu.memory_space<vmem>>, vector<16x128xf32>
    tpu.vector_store %arg8[%c0_6, %c0_7], %7 {strides = array<i32>} : memref<16x128xf32, #tpu.memory_space<vmem>>, vector<16x128xf32>,
    %c0_i32_8 = arith.constant 0 : i32
    %9 = arith.cmpi eq, %arg1, %c0_i32_8 : i32
    %10 = arith.extui %9 : i1 to i32
    %c0_i32_9 = arith.constant 0 : i32
    %11 = arith.cmpi ne, %10, %c0_i32_9 : i32
    scf.if %11 {
      %c0_10 = arith.constant 0 : index
      %c0_11 = arith.constant 0 : index
      %12 = vector.load %arg8[%c0_10, %c0_11] : memref<16x128xf32, #tpu.memory_space<vmem>>, vector<16x128xf32>
      %c0_12 = arith.constant 0 : index
      %c0_13 = arith.constant 0 : index
      %13 = vector.load %arg4[%c0_12, %c0_13] : memref<1x128xf32, #tpu.memory_space<vmem>>, vector<1x128xf32>
      %14 = vector.broadcast %13 : vector<1x128xf32> to vector<16x128xf32>
      %15 = arith.addf %12, %14 : vector<16x128xf32>
      %cst_14 = arith.constant 0.000000e+00 : f32
      %16 = vector.broadcast %cst_14 : f32 to vector<16x128xf32>
      %17 = arith.maximumf %15, %16 : vector<16x128xf32>
      %c0_15 = arith.constant 0 : index
      %c0_16 = arith.constant 0 : index
      %18 = vector.load %arg5[%c0_15, %c0_16] : memref<128x128xf32, #tpu.memory_space<vmem>>, vector<128x128xf32>
      %cst_17 = arith.constant dense<0.000000e+00> : vector<16x128xf32>
      %19 = tpu.matmul %17, %18, %cst_17 {dimension_numbers = #tpu.dot_dimension_numbers<[1], [0], [0], [1], [0, 0, 1, 1], [], []>} : vector<16x128xf32>, vector<128x128xf32>, vector<16x128xf32> -> vector<16x128xf32>
      %c0_18 = arith.constant 0 : index
      %c0_19 = arith.constant 0 : index
      %20 = vector.load %arg6[%c0_18, %c0_19] : memref<1x128xf32, #tpu.memory_space<vmem>>, vector<1x128xf32>
      %21 = vector.broadcast %20 : vector<1x128xf32> to vector<16x128xf32>
      %22 = arith.addf %19, %21 : vector<16x128xf32>
      %cst_20 = arith.constant 0.000000e+00 : f32
      %23 = vector.broadcast %cst_20 : f32 to vector<16x128xf32>
      %24 = arith.maximumf %22, %23 : vector<16x128xf32>
      %c0_21 = arith.constant 0 : index
      %c0_22 = arith.constant 0 : index
      %25 = vector.load %arg7[%c0_21, %c0_22] : memref<16x128xf32, #tpu.memory_space<vmem>>, vector<16x128xf32>
      tpu.vector_store %arg7[%c0_21, %c0_22], %24 {strides = array<i32>} : memref<16x128xf32, #tpu.memory_space<vmem>>, vector<16x128xf32>,
    } else {
    }
    return
  }
  func.func @transform_0(%arg0: i32, %arg1: i32) -> (i32, i32) {
    %c0_i32 = arith.constant 0 : i32
    return %arg0, %arg1 : i32, i32
  }
  func.func @transform_1(%arg0: i32, %arg1: i32) -> (i32, i32) {
    %c0_i32 = arith.constant 0 : i32
    %c0_i32_0 = arith.constant 0 : i32
    return %arg1, %c0_i32 : i32, i32
  }
  func.func @transform_2(%arg0: i32, %arg1: i32) -> (i32, i32) {
    %c0_i32 = arith.constant 0 : i32
    %c0_i32_0 = arith.constant 0 : i32
    %c0_i32_1 = arith.constant 0 : i32
    return %c0_i32, %c0_i32_0 : i32, i32
  }
  func.func @transform_3(%arg0: i32, %arg1: i32) -> (i32, i32) {
    %c0_i32 = arith.constant 0 : i32
    %c0_i32_0 = arith.constant 0 : i32
    %c0_i32_1 = arith.constant 0 : i32
    return %c0_i32, %c0_i32_0 : i32, i32
  }
  func.func @transform_4(%arg0: i32, %arg1: i32) -> (i32, i32) {
    %c0_i32 = arith.constant 0 : i32
    %c0_i32_0 = arith.constant 0 : i32
    %c0_i32_1 = arith.constant 0 : i32
    return %c0_i32, %c0_i32_0 : i32, i32
  }
  func.func @transform_5(%arg0: i32, %arg1: i32) -> (i32, i32) {
    %c0_i32 = arith.constant 0 : i32
    %c0_i32_0 = arith.constant 0 : i32
    return %arg0, %c0_i32 : i32, i32
  }
}

</mosaic_0001>

<bundles_post_ra>
// kernel: tpu_custom_call.1
= control target key start
LH: loop header
LB: loop body
LE: loop exit
PB: predicated region body
PF: predicated region fallthrough
CT: control target
= control target key end

     0   :  { %10 = vsyncpa [#allocation4], 0  ;;  %s1412_s0 = inlined_call_operand.hbm [shape: f32[32,256], index: 0, kind: input, shape index: {}]   ;;  %s1413_s1 = inlined_call_operand.hbm [shape: f32[256,128], index: 1, kind: input, shape index: {}]   ;;  %s1414_s2 = inlined_call_operand.vmem [shape: f32[1,128], index: 2, kind: input, shape index: {}]   ;;  %s1415_s3 = inlined_call_operand.hbm [shape: f32[128,128], index: 3, kind: input, shape index: {}]   ;;  %s1416_s4 = inlined_call_operand.vmem [shape: f32[1,128], index: 4, kind: input, shape index: {}]   ;;  %s1417_s5 = inlined_call_operand.hbm [shape: f32[32,128], index: 5, kind: output, shape index: {}]  }
   0x1   :  { %12 = vsyncpa [#allocation4 + $0x1], 0 }
   0x2   :  { %13 = vsyncpa [#allocation7], 0 }
   0x3   :  { %14 = vsyncpa [#allocation5], 0 }
   0x4   :  { %16 = vsyncpa [#allocation5 + $0x1], 0  ;;  %s1144_s18 = smov 0   ;;  %s1146_s19 = smov 0  }
   0x5   :  { %s1148_s20 = smov 0   ;;  %s1150_s21 = smov 0  }
   0x6   :  { %s1152_s22 = smov 0   ;;  %s1154_s23 = smov 0  }
   0x7 LB: > { %s661_s24 = sadd.s32 4294967295, %s1102_s23   ;;  %s662_s25 = sadd.s32 4294967294, %s1102_s23   ;;  %s1102_s23 = sphi %s1154_s23, %s22_s23   ;;  %s1098_s22 = sphi %s1152_s22, %s1439_s22   ;;  %s1094_s21 = sphi %s1150_s21, %s1438_s21   ;;  %s1090_s20 = sphi %s1148_s20, %s1437_s20   ;;  %s1086_s19 = sphi %s1146_s19, %s1436_s19   ;;  %s1082_s18 = sphi %s1144_s18, %s1435_s18  }
   0x8   : > { %p56_p0 = scmp.ne.s32.totalorder %s1086_s19, %s1082_s18  ;;  %p1178_p1 = scmp.eq.s32.totalorder %s661_s24, 0 }
   0x9   : > { %p1182_p2 = scmp.eq.s32.totalorder %s661_s24, 1  ;;  %p175_p3 = scmp.eq.s32.totalorder %s662_s25, 1 }
   0xa   : > { %s1422_s26 = scalar_select %p1178_p1, 1, 0 }
   0xb   : > { %p1188_p4 = por %p1178_p1, %p56_p0  ;;  %p663_p5 = scmp.ge.s32.totalorder %s1102_s23, 1 }
   0xc   : > { %p1193_p6 = por %p175_p3, %p56_p0  ;;  %p182_p7 = scmp.lt.s32.totalorder %s1102_s23, 3 }
   0xd   : > { %s1424_s28 = scalar_select %p1188_p4, 1, 0 }
   0xe   : > { %s1425_s29 = scalar_select %p1193_p6, 1, 0 }
   0xf   : > { %p1198_p8 = pnand %p663_p5, %p182_p7  ;;  %s1104_s6 = smov [#allocation6]  }
  0x10   : > { %s197_s7 = sshll.u32 %s1104_s6, 4  ;;  %s1105_s9 = smov [#allocation8]   ;;  %s1202_s7 = int_to_ptr.vmem [resolvable:$true] %s197_s7 }
  0x11   : > { %p853_p9 = pneg %p1198_p8  ;;  %s213_s10 = sshll.u32 %s1105_s9, 4  ;;  %s1213_s10 = int_to_ptr.vmem [resolvable:$true] %s213_s10 }
  0x12   : > { %s930_s13 = scalar_lea.hbm %s1413_s1, 4096 }
  0x13   : > { %p1209_p11 = pnand %p853_p9, %p1178_p1  ;;  %p931_p12 = scmp.ne.s32.totalorder %s1413_s1, %s930_s13 }
  0x14   : > { %p937_p5 = scmp.lt.u32.totalorder %s930_s13, %s1413_s1 }
  0x15   : > { %p932_p13 = pneg %p1209_p11 }
  0x17   : > { %p933_p0 = pnand %p932_p13, %p931_p12 }
  0x19   : > { %p934_p3 = pneg %p933_p0 }
  0x1b   : > { %p939_p7 = pnand %p937_p5, %p934_p3 }
  0x1d   : > { %942 = shalt.err (!%p939_p7)
}
  0x1e   : > { %s943_s24 = scalar_lea.vmem %s1202_s7, 4096  ;;  %p951_p1 = scmp.lt.s32.totalorder %s1202_s7, %s1202_s7 }
  0x1f   : > { %p944_p9 = scmp.ne.s32.totalorder %s1202_s7, %s943_s24  ;;  %p952_p12 = scmp.lt.s32.totalorder %s943_s24, %s943_s24 }
  0x21   : > { %p946_p10 = pnand %p944_p9, %p932_p13  ;;  %p953_p0 = por %p952_p12, %p951_p1 }
  0x23   : > { %p947_p6 = pneg %p946_p10 }
  0x25   : > { %p954_p4 = pnand %p953_p0, %p947_p6 }
  0x27   : > { %957 = shalt.err (!%p954_p4)
}
  0x28   : > { %s1106_s25 = smov 128   ;;  %s1107_s6 = smov 8  }
  0x29   : > { %856 = dma.hbm_to_vmem [thread:$0]  (!%p1209_p11), %s1413_s1, 4096, %s1202_s7, [#allocation7], %s1106_s25, %s1106_s25, %s1107_s6  }
  0x2a   : > { %s958_s14 = scalar_lea.hbm %s1415_s3, 2048 }
  0x2b   : > { %p959_p1 = scmp.ne.s32.totalorder %s1415_s3, %s958_s14  ;;  %p965_p10 = scmp.lt.u32.totalorder %s958_s14, %s1415_s3 }
  0x2d   : > { %p961_p4 = pnand %p959_p1, %p932_p13 }
  0x2f   : > { %p962_p6 = pneg %p961_p4 }
  0x31   : > { %p967_p3 = pnand %p965_p10, %p962_p6 }
  0x33   : > { %970 = shalt.err (!%p967_p3)
}
  0x34   : > { %s971_s7 = scalar_lea.vmem %s1213_s10, 2048  ;;  %p979_p12 = scmp.lt.s32.totalorder %s1213_s10, %s1213_s10 }
  0x35   : > { %p972_p5 = scmp.ne.s32.totalorder %s1213_s10, %s971_s7  ;;  %p980_p0 = scmp.lt.s32.totalorder %s971_s7, %s971_s7 }
  0x37   : > { %p974_p7 = pnand %p972_p5, %p932_p13  ;;  %p981_p1 = por %p980_p0, %p979_p12 }
  0x39   : > { %p975_p9 = pneg %p974_p7 }
  0x3b   : > { %p982_p4 = pnand %p981_p1, %p975_p9 }
  0x3d   : > { %985 = shalt.err (!%p982_p4)
}
  0x3e   : > { %859 = dma.hbm_to_vmem [thread:$0]  (!%p1209_p11), %s1415_s3, 2048, %s1213_s10, [#allocation7], %s1106_s25, %s1106_s25, %s1107_s6  }
  0x3f   : > { %s34_s12 = sadd.s32 1, %s1098_s22  ;;  %s43_s13 = sadd.s32 1, %s1090_s20 }
  0x40   : > { %p36_p13 = scmp.ge.s32.totalorder %s34_s12, 2  ;;  %p50_p6 = scmp.ne.s32.totalorder %s1090_s20, %s1086_s19 }
  0x41   : > { %p51_p10 = scmp.eq.s32.totalorder %s1102_s23, 0  ;;  %p870_p3 = scmp.lt.s32.totalorder %s1102_s23, 2 }
  0x42   : > { %s1441_s12 = smov (%p36_p13, %s34_s12), 0  ;;  %p1277_p7 = por %p1182_p2, %p50_p6 }
  0x43   : > { %p52_p5 = por %p51_p10, %p50_p6  ;;  %s38_s14 = ssub.s32 %s1098_s22, %s1441_s12 }
  0x44   : > { %s1428_s8 = scalar_select %p1277_p7, 1, 0 }
  0x45   : > { %s230_s15 = sand.u32 1, %s1090_s20   ;;  %p41_p9 = scmp.eq.s32.totalorder %s38_s14, 0 }
  0x46   : > { %s667_s10 = sshll.u32 %s230_s15, 5  ;;  %s684_s25 = sshll.u32 %s1098_s22, 9 }
  0x47   : > { %s1286_s6 = scalar_select %p41_p9, %s1090_s20, %s43_s13  }
  0x48   : > { %s1291_s24 = scalar_lea.hbm %s1412_s0, %s684_s25  ;;  %s234_s27 = scalar_lea.vmem [#allocation3], %s667_s10 }
  0x49   : > { %s244_s7 = sshll.u32 %s234_s27, 4  ;;  %p1295_p2 = pnand %p870_p3, %p52_p5  ;;  %s1299_s7 = int_to_ptr.vmem [resolvable:$true] %s244_s7 }
  0x4a   : > { %s1301_s11 = scalar_lea.sflag [#allocation4], %s230_s15  ;;  %s986_s13 = scalar_lea.hbm %s1291_s24, 512 }
  0x4b   : > { %p987_p11 = scmp.ne.s32.totalorder %s1291_s24, %s986_s13  ;;  %p988_p12 = pneg %p1295_p2 }
  0x4c   : > { %s991_s25 = scalar_lea.hbm %s1412_s0, 1024  ;;  %p992_p4 = scmp.lt.u32.totalorder %s1291_s24, %s1412_s0 }
  0x4d   : > { %p989_p0 = pnand %p988_p12, %p987_p11  ;;  %p993_p13 = scmp.lt.u32.totalorder %s991_s25, %s986_s13 }
  0x4e   : > { %p995_p10 = scmp.lt.u32.totalorder %s986_s13, %s1291_s24 }
  0x4f   : > { %p990_p1 = pneg %p989_p0  ;;  %p994_p6 = por %p993_p13, %p992_p4 }
  0x51   : > { %p996_p3 = por %p995_p10, %p994_p6 }
  0x53   : > { %p997_p5 = pnand %p996_p3, %p990_p1 }
  0x55   : > { %1000 = shalt.err (!%p997_p5)
}
  0x56   : > { %s1001_s15 = scalar_lea.vmem %s1299_s7, 512  ;;  %s1108_s27 = smov [#allocation3]  }
  0x57   : > { %p1002_p9 = scmp.ne.s32.totalorder %s1299_s7, %s1001_s15  ;;  %s1006_s14 = sshll.u32 %s1108_s27, 4  ;;  %s1007_s14 = int_to_ptr.vmem [resolvable:$false] %s1006_s14 }
  0x58   : > { %s1008_s10 = scalar_lea.vmem %s1007_s14, 1024  ;;  %p1009_p7 = scmp.lt.s32.totalorder %s1299_s7, %s1007_s14 }
  0x59   : > { %p1004_p11 = pnand %p1002_p9, %p988_p12  ;;  %p1010_p4 = scmp.lt.s32.totalorder %s1008_s10, %s1001_s15 }
  0x5b   : > { %p1005_p0 = pneg %p1004_p11  ;;  %p1011_p13 = por %p1010_p4, %p1009_p7 }
  0x5d   : > { %p1012_p6 = pnand %p1011_p13, %p1005_p0 }
  0x5f   : > { %1015 = shalt.err (!%p1012_p6)
}
  0x60   : > { %s1109_s13 = smov 256   ;;  %s1110_s25 = smov 16  }
  0x61   : > { %863 = dma.hbm_to_vmem [thread:$0]  (!%p1295_p2), %s1291_s24, 512, %s1299_s7, %s1301_s11, %s1109_s13, %s1109_s13, %s1110_s25  }
  0x62   : > { %256 = sbr.rel (%p1198_p8) target bundleno = 599 (0x257), region = 40  ;;  %s1332_s16 = sand.u32 (!%p1198_p8), 1, %s1086_s19  }
  0x63   : > { %s672_s17 = sshll.u32 (!%p1198_p8), %s1332_s16, 5  ;;  %s259_s15 = scalar_lea.sflag (!%p1198_p8), [#allocation4], %s1332_s16 }
  0x64   : > { %s1336_s27 = scalar_lea.vmem (!%p1198_p8), [#allocation3], %s672_s17  ;;  %p1430_p7 = scmp.ne.s32.totalorder (!%p1198_p8), %s1424_s28, 0 }
  0x69   : > { %1069 = dma.done.wait (%p1430_p7), %s259_s15, 512  }
  0x6a   : > { %1071 = vsyncadd (%p1430_p7), %s259_s15, 4294966784  ;;  %p1431_p2 = scmp.ne.s32.totalorder %s1422_s26, 0 }
  0x6c   : > { %1073 = dma.done.wait (%p1431_p2), [#allocation7], 6144  }
  0x6d   : > { %1075 = vsyncadd (%p1431_p2), [#allocation7], 4294961152  ;;  %v329_v0 = vld [vmem:[#allocation6 + $0x80] sm:$0xff]  ;;  %v330_v1 = vld [vmem:[#allocation6 + $0x88] sm:$0xff]  ;;  %s675_s30 = sshll.u32 %s1332_s16, 4  ;;  %s685_s14 = sshll.u32 %s1094_s21, 8 }
  0x6e   : > { %v313_v2 = vld [vmem:[#allocation6] sm:$0xff]  ;;  %v777_v3 = vpack.c.bf16 %v330_v1, %v329_v0  ;;  %v314_v4 = vld [vmem:[#allocation6 + $0x8] sm:$0xff]  ;;  %v331_v5 = vld [vmem:[#allocation6 + $0x90] sm:$0xff]  ;;  %s296_s9 = scalar_lea.vmem [#allocation9], %s675_s30  ;;  %s1363_s25 = scalar_lea.hbm %s1417_s5, %s685_s14 }
  0x6f   : > { %v332_v6 = vld [vmem:[#allocation6 + $0x98] sm:$0xff]  ;;  %v779_v7 = vpack.c.bf16 %v314_v4, %v313_v2  ;;  %v315_v9 = vld [vmem:[#allocation6 + $0x10] sm:$0xff]  ;;  %v333_v11 = vld [vmem:[#allocation6 + $0xa0] sm:$0xff]  ;;  %s556_s11 = sshll.u32 %s296_s9, 4  ;;  %s543_s17 = scalar_lea.sflag [#allocation5], %s1332_s16  ;;  %s1358_s11 = int_to_ptr.vmem [resolvable:$true] %s556_s11 }
  0x70   : > { %v781_v8 = vpack.c.bf16 %v332_v6, %v331_v5  ;;  %v316_v10 = vld [vmem:[#allocation6 + $0x18] sm:$0xff]  ;;  %778 = vmatprep.subr.bf16.mxu0 %v777_v3  ;;  %v334_v12 = vld [vmem:[#allocation6 + $0xa8] sm:$0xff]  ;;  %v317_v15 = vld [vmem:[#allocation6 + $0x20] sm:$0xff]  ;;  %s1016_s15 = scalar_lea.vmem %s1358_s11, 256  ;;  %p1432_p12 = scmp.ne.s32.totalorder %s1428_s8, 0 }
  0x71   : > { %780 = vmatpush3.bf16.msra.mxu0 %v779_v7  ;;  %v783_v13 = vpack.c.bf16 %v316_v10, %v315_v9  ;;  %v785_v14 = vpack.c.bf16 %v334_v12, %v333_v11  ;;  %v318_v16 = vld [vmem:[#allocation6 + $0x28] sm:$0xff]  ;;  %v335_v17 = vld [vmem:[#allocation6 + $0xb0] sm:$0xff]  ;;  %v336_v18 = vld [vmem:[#allocation6 + $0xb8] sm:$0xff]  ;;  %p1017_p8 = scmp.ne.s32.totalorder %s1358_s11, %s1016_s15  ;;  %s1111_s21 = smov [#allocation9]  }
  0x72   : > { %782 = vmatprep.subr.bf16.mxu0 %v781_v8  ;;  %v787_v19 = vpack.c.bf16 %v318_v16, %v317_v15  ;;  %v789_v20 = vpack.c.bf16 %v336_v18, %v335_v17  ;;  %v319_v21 = vld [vmem:[#allocation6 + $0x30] sm:$0xff]  ;;  %v320_v22 = vld [vmem:[#allocation6 + $0x38] sm:$0xff]  ;;  %v337_v23 = vld [vmem:[#allocation6 + $0xc0] sm:$0xff] }
  0x73   : > { %v338_v24 = vld [vmem:[#allocation6 + $0xc8] sm:$0xff]  ;;  %v321_v26 = vld [vmem:[#allocation6 + $0x40] sm:$0xff]  ;;  %v791_v27 = vpack.c.bf16 %v320_v22, %v319_v21  ;;  %v442_v30 = vld [vmem:[#allocation8 + $0x10] sm:$0xff]  ;;  %p1018_p1 = pnand %p1017_p8, %p1432_p12 }
  0x74   : > { %v310_v25 = vld [vmem:[%s1336_s27 + $0x8] sm:$0xff]  ;;  %v440_v28 = vld [vmem:[#allocation8] sm:$0xff]  ;;  %v793_v31 = vpack.c.bf16 %v338_v24, %v337_v23  ;;  %v339_v33 = vld [vmem:[#allocation6 + $0xd0] sm:$0xff] }
  0x75   : > { %784 = vmatpush3.bf16.msra.mxu0 %v783_v13  ;;  %409 = vmatprep.mubr.f32.mxu0 %v310_v25  ;;  %v441_v29 = vld [vmem:[#allocation8 + $0x8] sm:$0xff]  ;;  %v443_v35 = vld [vmem:[#allocation8 + $0x18] sm:$0xff]  ;;  %v444_v38 = vld [vmem:[#allocation8 + $0x20] sm:$0xff]  ;;  %p1019_p10 = pneg %p1018_p1 }
  0x76   : > { %786 = vmatprep.subr.bf16.mxu0 %v785_v14  ;;  %v322_v32 = vld [vmem:[#allocation6 + $0x48] sm:$0xff]  ;;  %v809_v34 = vpack.c.bf16 %v441_v29, %v440_v28  ;;  %v340_v36 = vld [vmem:[#allocation6 + $0xd8] sm:$0xff]  ;;  %v813_v37 = vpack.c.bf16 %v443_v35, %v442_v30  ;;  %v323_v42 = vld [vmem:[#allocation6 + $0x50] sm:$0xff] }
  0x77   : > { %v445_v39 = vld [vmem:[#allocation8 + $0x28] sm:$0xff]  ;;  %v795_v40 = vpack.c.bf16 %v322_v32, %v321_v26  ;;  %v797_v41 = vpack.c.bf16 %v340_v36, %v339_v33  ;;  %v324_v43 = vld [vmem:[#allocation6 + $0x58] sm:$0xff]  ;;  %v341_v44 = vld [vmem:[#allocation6 + $0xe0] sm:$0xff] }
  0x78   : > { %810 = vmatprep.subr.bf16.mxu1 %v809_v34  ;;  %v817_v45 = vpack.c.bf16 %v445_v39, %v444_v38  ;;  %v342_v46 = vld [vmem:[#allocation6 + $0xe8] sm:$0xff]  ;;  %v446_v47 = vld [vmem:[#allocation8 + $0x30] sm:$0xff]  ;;  %v447_v48 = vld [vmem:[#allocation8 + $0x38] sm:$0xff]  ;;  %v799_v49 = vpack.c.bf16 %v324_v43, %v323_v42 }
  0x79   : > { %788 = vmatpush3.bf16.msra.mxu0 %v787_v19  ;;  %812 = vmatpush3.bf16.msra.mxu1 %v809_v34  ;;  %v801_v50 = vpack.c.bf16 %v342_v46, %v341_v44  ;;  %v325_v51 = vld [vmem:[#allocation6 + $0x60] sm:$0xff]  ;;  %v326_v52 = vld [vmem:[#allocation6 + $0x68] sm:$0xff]  ;;  %v343_v53 = vld [vmem:[#allocation6 + $0xf0] sm:$0xff]  ;;  %v821_v54 = vpack.c.bf16 %v447_v48, %v446_v47 }
  0x7a   : > { %790 = vmatprep.subr.bf16.mxu0 %v789_v20  ;;  %814 = vmatprep.subr.bf16.mxu1 %v813_v37  ;;  %v344_v55 = vld [vmem:[#allocation6 + $0xf8] sm:$0xff]  ;;  %v448_v56 = vld [vmem:[#allocation8 + $0x40] sm:$0xff]  ;;  %v449_v57 = vld [vmem:[#allocation8 + $0x48] sm:$0xff]  ;;  %v803_v58 = vpack.c.bf16 %v326_v52, %v325_v51 }
  0x7b   : > { %v805_v59 = vpack.c.bf16 %v344_v55, %v343_v53  ;;  %v327_v60 = vld [vmem:[#allocation6 + $0x70] sm:$0xff]  ;;  %v328_v61 = vld [vmem:[#allocation6 + $0x78] sm:$0xff]  ;;  %v825_v62 = vpack.c.bf16 %v449_v57, %v448_v56  ;;  %v309_v0 = vld [vmem:[%s1336_s27] sm:$0xff] }
  0x7c   : > { %v807_v63 = vpack.c.bf16 %v328_v61, %v327_v60  ;;  %v312_v1 = vld [vmem:[%s1336_s27 + $0x18] sm:$0xff]  ;;  %v311_v2 = vld [vmem:[%s1336_s27 + $0x10] sm:$0xff]  ;;  %v452_v6 = vld [vmem:[#allocation8 + $0x60] sm:$0xff]  ;;  %s1020_s27 = sshll.u32 %s1111_s21, 4  ;;  %s1021_s27 = int_to_ptr.vmem [resolvable:$false] %s1020_s27 }
  0x7d   : > { %792 = vmatpush3.bf16.msra.mxu0 %v791_v27  ;;  %816 = vmatpush3.bf16.msra.mxu1 %v813_v37  ;;  %v450_v3 = vld [vmem:[#allocation8 + $0x50] sm:$0xff]  ;;  %v451_v4 = vld [vmem:[#allocation8 + $0x58] sm:$0xff]  ;;  %v453_v7 = vld [vmem:[#allocation8 + $0x68] sm:$0xff]  ;;  %s1022_s26 = scalar_lea.vmem %s1021_s27, 512  ;;  %p1023_p3 = scmp.lt.s32.totalorder %s1358_s11, %s1021_s27 }
  0x7e   : > { %794 = vmatprep.subr.bf16.mxu0 %v793_v31  ;;  %818 = vmatprep.subr.bf16.mxu1 %v817_v45  ;;  %v829_v5 = vpack.c.bf16 %v451_v4, %v450_v3  ;;  %v833_v8 = vpack.c.bf16 %v453_v7, %v452_v6  ;;  %v454_v9 = vld [vmem:[#allocation8 + $0x70] sm:$0xff]  ;;  %v455_v10 = vld [vmem:[#allocation8 + $0x78] sm:$0xff]  ;;  %v676_v14 = vld [vmem:[%s1414_s2] ss:$0 sm:$0xff]  ;;  %p1024_p5 = scmp.lt.s32.totalorder %s1022_s26, %s1016_s15 }
  0x7f   : > { %v837_v11 = vpack.c.bf16 %v455_v10, %v454_v9  ;;  %v677_v23 = vld [vmem:[%s1416_s4] ss:$0 sm:$0xff] }
  0x80   : > { %p1025_p9 = por %p1024_p5, %p1023_p3 }
  0x81   : > { %796 = vmatpush3.bf16.msra.mxu0 %v795_v40  ;;  %820 = vmatpush3.bf16.msra.mxu1 %v817_v45 }
  0x82   : > { %798 = vmatprep.subr.bf16.mxu0 %v797_v41  ;;  %822 = vmatprep.subr.bf16.mxu1 %v821_v54  ;;  %p1026_p11 = pnand %p1025_p9, %p1019_p10 }
  0x85   : > { %800 = vmatpush3.bf16.msra.mxu0 %v799_v49  ;;  %824 = vmatpush3.bf16.msra.mxu1 %v821_v54 }
  0x86   : > { %802 = vmatprep.subr.bf16.mxu0 %v801_v50  ;;  %826 = vmatprep.subr.bf16.mxu1 %v825_v62 }
  0x89   : > { %804 = vmatpush3.bf16.msra.mxu0 %v803_v58  ;;  %828 = vmatpush3.bf16.msra.mxu1 %v825_v62 }
  0x8a   : > { %806 = vmatprep.subr.bf16.mxu0 %v805_v59  ;;  %830 = vmatprep.subr.bf16.mxu1 %v829_v5 }
  0x8d   : > { %808 = vmatpush3.bf16.msra.mxu0 %v807_v63  ;;  %832 = vmatpush3.bf16.msra.mxu1 %v829_v5 }
  0x8e   : > { %834 = vmatprep.subr.bf16.mxu1 %v833_v8 }
  0x90   : > { %410 = vmatmul.mubr.f32.vlgmr.msra.gmra.mrb[0].mxu0 %v309_v0 }
  0x91   : > { %414 = vmatprep.mubr.f32.mxu0 %v312_v1  ;;  %836 = vmatpush3.bf16.msra.mxu1 %v833_v8 }
  0x92   : > { %838 = vmatprep.subr.bf16.mxu1 %v837_v11 }
  0x94   : > { %415 = vmatmul.mubr.f32.gmra.mrb[2].mxu0 %v311_v2 }
  0x95   : > { %840 = vmatpush3.bf16.msra.mxu1 %v837_v11 }
 0x163   : > { %v718_v12 = vpop.f32.mrb[0].mxu0 }
 0x164   : > { %v719_v13 = vpop.f32.mrb[1].mxu0 }
 0x165   : > { %v720_v15 = vadd.f32 %v719_v13, %v718_v12 }
 0x167   : > { %v721_v16 = vpop.f32.mrb[2].mxu0  ;;  %v436_v17 = vadd.f32 %v720_v15, %v676_v14 }
 0x168   : > { %v722_v18 = vpop.f32.mrb[3].mxu0 }
 0x169   : > { %v723_v19 = vadd.f32 %v722_v18, %v721_v16  ;;  %v438_v20 = vmax.f32 %v436_v17, 0.0 }
 0x16b   : > { %v437_v21 = vadd.f32 %v723_v19, %v676_v14  ;;  %774 = vmatprep.mubr.f32.mxu1 %v438_v20 }
 0x16d   : > { %v439_v22 = vmax.f32 %v437_v21, 0.0 }
 0x16f   : > { %775 = vmatmul.mubr.f32.vlgmr.msra.gmra.mrb[0].mxu1 %v439_v22 }
 0x242   : > { %v776_v24 = vpop.f32.mrb[0].mxu1 }
 0x243   : > { %v535_v25 = vadd.f32 %v776_v24, %v677_v23  ;;  %v529_v26 = vpop.f32.mrb[1].mxu1 }
 0x244   : > { %v530_v27 = vadd.f32 %v677_v23, %v529_v26 }
 0x245   : > { %v539_v28 = vmax.f32 %v535_v25, 0.0 }
 0x246   : > { %v538_v29 = vmax.f32 %v530_v27, 0.0 }
 0x247   : > { %541 = vst [vmem:[%s296_s9 + $0x8] sm:$0xff] %v539_v28 }
 0x248   : > { %540 = vst [vmem:[%s296_s9] sm:$0xff] %v538_v29 }
 0x249   : > { %1029 = shalt.err (!%p1026_p11)
}
 0x24a   : > { %s1030_s28 = scalar_lea.hbm %s1363_s25, 256  ;;  %s1034_s7 = scalar_lea.hbm %s1417_s5, 512 }
 0x24b   : > { %p1031_p0 = scmp.ne.s32.totalorder %s1363_s25, %s1030_s28  ;;  %p1035_p6 = scmp.lt.u32.totalorder %s1363_s25, %s1417_s5 }
 0x24c   : > { %p1036_p7 = scmp.lt.u32.totalorder %s1034_s7, %s1030_s28  ;;  %p1038_p8 = scmp.lt.u32.totalorder %s1030_s28, %s1363_s25 }
 0x24d   : > { %p1032_p4 = pnand %p1031_p0, %p1432_p12 }
 0x24e   : > { %p1037_p2 = por %p1036_p7, %p1035_p6 }
 0x24f   : > { %p1033_p13 = pneg %p1032_p4 }
 0x250   : > { %p1039_p1 = por %p1038_p8, %p1037_p2 }
 0x252   : > { %p1040_p10 = pnand %p1039_p1, %p1033_p13 }
 0x254   : > { %1043 = shalt.err (!%p1040_p10)
}
 0x255   : > { %s1112_s10 = smov 128   ;;  %s1113_s13 = smov 8  }
 0x256   : > { %851 = dma.vmem_to_hbm [thread:$0]  (%p1432_p12), %s1358_s11, 256, %s1363_s25, %s543_s17, %s1112_s10, %s1112_s10, %s1113_s13  }
 0x257 PF: > { %s571_s15 = sand.u32 1, %s1082_s18   ;;  %p1433_p3 = scmp.ne.s32.totalorder %s1425_s29, 0 }
 0x258   : > { %p1434_p5 = scmp.ge.s32.totalorder %s1102_s23, 2  ;;  %s572_s21 = scalar_lea.sflag [#allocation5], %s571_s15 }
 0x25a   : > { %p865_p9 = pnand %p1434_p5, %p1433_p3 }
 0x25c   : > { %1077 = dma.done.wait (!%p865_p9), %s572_s21, 256  }
 0x25d   : > { %1079 = vsyncadd (!%p865_p9), %s572_s21, 4294967040  ;;  %s22_s23 = sadd.s32 1, %s1102_s23   ;;  %s1435_s18 = smov %s1086_s19 }
 0x25e   : > { %p19_p11 = scmp.ge.s32.totalorder %s22_s23, 4   ;;  %s1436_s19 = smov %s1090_s20 }
 0x25f   : > { %s1437_s20 = smov %s1286_s6  ;;  %s1438_s21 = smov %s1098_s22 }
 0x260   : > { %s1439_s22 = smov %s1441_s12  ;;  %21 = sbr.rel (!%p19_p11) target bundleno = 7 (0x7), region = 102 }
 0x267   :  { %577 = vsyncpa [#allocation4], 1 }
 0x268   :  { %579 = vsyncpa [#allocation4 + $0x1], 1 }
 0x269   :  { %580 = vsyncpa [#allocation7], 1 }
 0x26a   :  { %581 = vsyncpa [#allocation5], 1 }
 0x26b   :  { %583 = vsyncpa [#allocation5 + $0x1], 1 }

// kernel: tpu_custom_call.1
= control target key start
LH: loop header
LB: loop body
LE: loop exit
PB: predicated region body
PF: predicated region fallthrough
CT: control target
= control target key end

     0   :  { %10 = vsyncpa [#allocation4], 0  ;;  %s1412_s0 = inlined_call_operand.hbm [shape: f32[32,256], index: 0, kind: input, shape index: {}]   ;;  %s1413_s1 = inlined_call_operand.hbm [shape: f32[256,128], index: 1, kind: input, shape index: {}]   ;;  %s1414_s2 = inlined_call_operand.vmem [shape: f32[1,128], index: 2, kind: input, shape index: {}]   ;;  %s1415_s3 = inlined_call_operand.hbm [shape: f32[128,128], index: 3, kind: input, shape index: {}]   ;;  %s1416_s4 = inlined_call_operand.vmem [shape: f32[1,128], index: 4, kind: input, shape index: {}]   ;;  %s1417_s5 = inlined_call_operand.hbm [shape: f32[32,128], index: 5, kind: output, shape index: {}]  }
   0x1   :  { %12 = vsyncpa [#allocation4 + $0x1], 0 }
   0x2   :  { %13 = vsyncpa [#allocation7], 0 }
   0x3   :  { %14 = vsyncpa [#allocation5], 0 }
   0x4   :  { %16 = vsyncpa [#allocation5 + $0x1], 0  ;;  %s1144_s18 = smov 0   ;;  %s1146_s19 = smov 0  }
   0x5   :  { %s1148_s20 = smov 0   ;;  %s1150_s21 = smov 0  }
   0x6   :  { %s1152_s22 = smov 0   ;;  %s1154_s23 = smov 0  }
   0x7 LB: > { %s661_s24 = sadd.s32 4294967295, %s1102_s23   ;;  %s662_s25 = sadd.s32 4294967294, %s1102_s23   ;;  %s1102_s23 = sphi %s1154_s23, %s22_s23   ;;  %s1098_s22 = sphi %s1152_s22, %s1439_s22   ;;  %s1094_s21 = sphi %s1150_s21, %s1438_s21   ;;  %s1090_s20 = sphi %s1148_s20, %s1437_s20   ;;  %s1086_s19 = sphi %s1146_s19, %s1436_s19   ;;  %s1082_s18 = sphi %s1144_s18, %s1435_s18  }
   0x8   : > { %p56_p0 = scmp.ne.s32.totalorder %s1086_s19, %s1082_s18  ;;  %p1178_p1 = scmp.eq.s32.totalorder %s661_s24, 0 }
   0x9   : > { %p1182_p2 = scmp.eq.s32.totalorder %s661_s24, 1  ;;  %p175_p3 = scmp.eq.s32.totalorder %s662_s25, 1 }
   0xa   : > { %s1422_s26 = scalar_select %p1178_p1, 1, 0 }
   0xb   : > { %p1188_p4 = por %p1178_p1, %p56_p0  ;;  %p663_p5 = scmp.ge.s32.totalorder %s1102_s23, 1 }
   0xc   : > { %p1193_p6 = por %p175_p3, %p56_p0  ;;  %p182_p7 = scmp.lt.s32.totalorder %s1102_s23, 3 }
   0xd   : > { %s1424_s28 = scalar_select %p1188_p4, 1, 0 }
   0xe   : > { %s1425_s29 = scalar_select %p1193_p6, 1, 0 }
   0xf   : > { %p1198_p8 = pnand %p663_p5, %p182_p7  ;;  %s1104_s6 = smov [#allocation6]  }
  0x10   : > { %s197_s7 = sshll.u32 %s1104_s6, 4  ;;  %s1105_s9 = smov [#allocation8]   ;;  %s1202_s7 = int_to_ptr.vmem [resolvable:$true] %s197_s7 }
  0x11   : > { %p853_p9 = pneg %p1198_p8  ;;  %s213_s10 = sshll.u32 %s1105_s9, 4  ;;  %s1213_s10 = int_to_ptr.vmem [resolvable:$true] %s213_s10 }
  0x12   : > { %s930_s13 = scalar_lea.hbm %s1413_s1, 4096 }
  0x13   : > { %p1209_p11 = pnand %p853_p9, %p1178_p1  ;;  %p931_p12 = scmp.ne.s32.totalorder %s1413_s1, %s930_s13 }
  0x14   : > { %p937_p5 = scmp.lt.u32.totalorder %s930_s13, %s1413_s1 }
  0x15   : > { %p932_p13 = pneg %p1209_p11 }
  0x17   : > { %p933_p0 = pnand %p932_p13, %p931_p12 }
  0x19   : > { %p934_p3 = pneg %p933_p0 }
  0x1b   : > { %p939_p7 = pnand %p937_p5, %p934_p3 }
  0x1d   : > { %942 = shalt.err (!%p939_p7)
}
  0x1e   : > { %s943_s24 = scalar_lea.vmem %s1202_s7, 4096  ;;  %p951_p1 = scmp.lt.s32.totalorder %s1202_s7, %s1202_s7 }
  0x1f   : > { %p944_p9 = scmp.ne.s32.totalorder %s1202_s7, %s943_s24  ;;  %p952_p12 = scmp.lt.s32.totalorder %s943_s24, %s943_s24 }
  0x21   : > { %p946_p10 = pnand %p944_p9, %p932_p13  ;;  %p953_p0 = por %p952_p12, %p951_p1 }
  0x23   : > { %p947_p6 = pneg %p946_p10 }
  0x25   : > { %p954_p4 = pnand %p953_p0, %p947_p6 }
  0x27   : > { %957 = shalt.err (!%p954_p4)
}
  0x28   : > { %s1106_s25 = smov 128   ;;  %s1107_s6 = smov 8  }
  0x29   : > { %856 = dma.hbm_to_vmem [thread:$0]  (!%p1209_p11), %s1413_s1, 4096, %s1202_s7, [#allocation7], %s1106_s25, %s1106_s25, %s1107_s6  }
  0x2a   : > { %s958_s14 = scalar_lea.hbm %s1415_s3, 2048 }
  0x2b   : > { %p959_p1 = scmp.ne.s32.totalorder %s1415_s3, %s958_s14  ;;  %p965_p10 = scmp.lt.u32.totalorder %s958_s14, %s1415_s3 }
  0x2d   : > { %p961_p4 = pnand %p959_p1, %p932_p13 }
  0x2f   : > { %p962_p6 = pneg %p961_p4 }
  0x31   : > { %p967_p3 = pnand %p965_p10, %p962_p6 }
  0x33   : > { %970 = shalt.err (!%p967_p3)
}
  0x34   : > { %s971_s7 = scalar_lea.vmem %s1213_s10, 2048  ;;  %p979_p12 = scmp.lt.s32.totalorder %s1213_s10, %s1213_s10 }
  0x35   : > { %p972_p5 = scmp.ne.s32.totalorder %s1213_s10, %s971_s7  ;;  %p980_p0 = scmp.lt.s32.totalorder %s971_s7, %s971_s7 }
  0x37   : > { %p974_p7 = pnand %p972_p5, %p932_p13  ;;  %p981_p1 = por %p980_p0, %p979_p12 }
  0x39   : > { %p975_p9 = pneg %p974_p7 }
  0x3b   : > { %p982_p4 = pnand %p981_p1, %p975_p9 }
  0x3d   : > { %985 = shalt.err (!%p982_p4)
}
  0x3e   : > { %859 = dma.hbm_to_vmem [thread:$0]  (!%p1209_p11), %s1415_s3, 2048, %s1213_s10, [#allocation7], %s1106_s25, %s1106_s25, %s1107_s6  }
  0x3f   : > { %s34_s12 = sadd.s32 1, %s1098_s22  ;;  %s43_s13 = sadd.s32 1, %s1090_s20 }
  0x40   : > { %p36_p13 = scmp.ge.s32.totalorder %s34_s12, 2  ;;  %p50_p6 = scmp.ne.s32.totalorder %s1090_s20, %s1086_s19 }
  0x41   : > { %p51_p10 = scmp.eq.s32.totalorder %s1102_s23, 0  ;;  %p870_p3 = scmp.lt.s32.totalorder %s1102_s23, 2 }
  0x42   : > { %s1441_s12 = smov (%p36_p13, %s34_s12), 0  ;;  %p1277_p7 = por %p1182_p2, %p50_p6 }
  0x43   : > { %p52_p5 = por %p51_p10, %p50_p6  ;;  %s38_s14 = ssub.s32 %s1098_s22, %s1441_s12 }
  0x44   : > { %s1428_s8 = scalar_select %p1277_p7, 1, 0 }
  0x45   : > { %s230_s15 = sand.u32 1, %s1090_s20   ;;  %p41_p9 = scmp.eq.s32.totalorder %s38_s14, 0 }
  0x46   : > { %s667_s10 = sshll.u32 %s230_s15, 5  ;;  %s684_s25 = sshll.u32 %s1098_s22, 9 }
  0x47   : > { %s1286_s6 = scalar_select %p41_p9, %s1090_s20, %s43_s13  }
  0x48   : > { %s1291_s24 = scalar_lea.hbm %s1412_s0, %s684_s25  ;;  %s234_s27 = scalar_lea.vmem [#allocation3], %s667_s10 }
  0x49   : > { %s244_s7 = sshll.u32 %s234_s27, 4  ;;  %p1295_p2 = pnand %p870_p3, %p52_p5  ;;  %s1299_s7 = int_to_ptr.vmem [resolvable:$true] %s244_s7 }
  0x4a   : > { %s1301_s11 = scalar_lea.sflag [#allocation4], %s230_s15  ;;  %s986_s13 = scalar_lea.hbm %s1291_s24, 512 }
  0x4b   : > { %p987_p11 = scmp.ne.s32.totalorder %s1291_s24, %s986_s13  ;;  %p988_p12 = pneg %p1295_p2 }
  0x4c   : > { %s991_s25 = scalar_lea.hbm %s1412_s0, 1024  ;;  %p992_p4 = scmp.lt.u32.totalorder %s1291_s24, %s1412_s0 }
  0x4d   : > { %p989_p0 = pnand %p988_p12, %p987_p11  ;;  %p993_p13 = scmp.lt.u32.totalorder %s991_s25, %s986_s13 }
  0x4e   : > { %p995_p10 = scmp.lt.u32.totalorder %s986_s13, %s1291_s24 }
  0x4f   : > { %p990_p1 = pneg %p989_p0  ;;  %p994_p6 = por %p993_p13, %p992_p4 }
  0x51   : > { %p996_p3 = por %p995_p10, %p994_p6 }
  0x53   : > { %p997_p5 = pnand %p996_p3, %p990_p1 }
  0x55   : > { %1000 = shalt.err (!%p997_p5)
}
  0x56   : > { %s1001_s15 = scalar_lea.vmem %s1299_s7, 512  ;;  %s1108_s27 = smov [#allocation3]  }
  0x57   : > { %p1002_p9 = scmp.ne.s32.totalorder %s1299_s7, %s1001_s15  ;;  %s1006_s14 = sshll.u32 %s1108_s27, 4  ;;  %s1007_s14 = int_to_ptr.vmem [resolvable:$false] %s1006_s14 }
  0x58   : > { %s1008_s10 = scalar_lea.vmem %s1007_s14, 1024  ;;  %p1009_p7 = scmp.lt.s32.totalorder %s1299_s7, %s1007_s14 }
  0x59   : > { %p1004_p11 = pnand %p1002_p9, %p988_p12  ;;  %p1010_p4 = scmp.lt.s32.totalorder %s1008_s10, %s1001_s15 }
  0x5b   : > { %p1005_p0 = pneg %p1004_p11  ;;  %p1011_p13 = por %p1010_p4, %p1009_p7 }
  0x5d   : > { %p1012_p6 = pnand %p1011_p13, %p1005_p0 }
  0x5f   : > { %1015 = shalt.err (!%p1012_p6)
}
  0x60   : > { %s1109_s13 = smov 256   ;;  %s1110_s25 = smov 16  }
  0x61   : > { %863 = dma.hbm_to_vmem [thread:$0]  (!%p1295_p2), %s1291_s24, 512, %s1299_s7, %s1301_s11, %s1109_s13, %s1109_s13, %s1110_s25  }
  0x62   : > { %256 = sbr.rel (%p1198_p8) target bundleno = 599 (0x257), region = 40  ;;  %s1332_s16 = sand.u32 (!%p1198_p8), 1, %s1086_s19  }
  0x63   : > { %s672_s17 = sshll.u32 (!%p1198_p8), %s1332_s16, 5  ;;  %s259_s15 = scalar_lea.sflag (!%p1198_p8), [#allocation4], %s1332_s16 }
  0x64   : > { %s1336_s27 = scalar_lea.vmem (!%p1198_p8), [#allocation3], %s672_s17  ;;  %p1430_p7 = scmp.ne.s32.totalorder (!%p1198_p8), %s1424_s28, 0 }
  0x69   : > { %1069 = dma.done.wait (%p1430_p7), %s259_s15, 512  }
  0x6a   : > { %1071 = vsyncadd (%p1430_p7), %s259_s15, 4294966784  ;;  %p1431_p2 = scmp.ne.s32.totalorder %s1422_s26, 0 }
  0x6c   : > { %1073 = dma.done.wait (%p1431_p2), [#allocation7], 6144  }
  0x6d   : > { %1075 = vsyncadd (%p1431_p2), [#allocation7], 4294961152  ;;  %v329_v0 = vld [vmem:[#allocation6 + $0x80] sm:$0xff]  ;;  %v330_v1 = vld [vmem:[#allocation6 + $0x88] sm:$0xff]  ;;  %s675_s30 = sshll.u32 %s1332_s16, 4  ;;  %s685_s14 = sshll.u32 %s1094_s21, 8 }
  0x6e   : > { %v313_v2 = vld [vmem:[#allocation6] sm:$0xff]  ;;  %v777_v3 = vpack.c.bf16 %v330_v1, %v329_v0  ;;  %v314_v4 = vld [vmem:[#allocation6 + $0x8] sm:$0xff]  ;;  %v331_v5 = vld [vmem:[#allocation6 + $0x90] sm:$0xff]  ;;  %s296_s9 = scalar_lea.vmem [#allocation9], %s675_s30  ;;  %s1363_s25 = scalar_lea.hbm %s1417_s5, %s685_s14 }
  0x6f   : > { %v332_v6 = vld [vmem:[#allocation6 + $0x98] sm:$0xff]  ;;  %v779_v7 = vpack.c.bf16 %v314_v4, %v313_v2  ;;  %v315_v9 = vld [vmem:[#allocation6 + $0x10] sm:$0xff]  ;;  %v333_v11 = vld [vmem:[#allocation6 + $0xa0] sm:$0xff]  ;;  %s556_s11 = sshll.u32 %s296_s9, 4  ;;  %s543_s17 = scalar_lea.sflag [#allocation5], %s1332_s16  ;;  %s1358_s11 = int_to_ptr.vmem [resolvable:$true] %s556_s11 }
  0x70   : > { %v781_v8 = vpack.c.bf16 %v332_v6, %v331_v5  ;;  %v316_v10 = vld [vmem:[#allocation6 + $0x18] sm:$0xff]  ;;  %778 = vmatprep.subr.bf16.mxu0 %v777_v3  ;;  %v334_v12 = vld [vmem:[#allocation6 + $0xa8] sm:$0xff]  ;;  %v317_v15 = vld [vmem:[#allocation6 + $0x20] sm:$0xff]  ;;  %s1016_s15 = scalar_lea.vmem %s1358_s11, 256  ;;  %p1432_p12 = scmp.ne.s32.totalorder %s1428_s8, 0 }
  0x71   : > { %780 = vmatpush3.bf16.msra.mxu0 %v779_v7  ;;  %v783_v13 = vpack.c.bf16 %v316_v10, %v315_v9  ;;  %v785_v14 = vpack.c.bf16 %v334_v12, %v333_v11  ;;  %v318_v16 = vld [vmem:[#allocation6 + $0x28] sm:$0xff]  ;;  %v335_v17 = vld [vmem:[#allocation6 + $0xb0] sm:$0xff]  ;;  %v336_v18 = vld [vmem:[#allocation6 + $0xb8] sm:$0xff]  ;;  %p1017_p8 = scmp.ne.s32.totalorder %s1358_s11, %s1016_s15  ;;  %s1111_s21 = smov [#allocation9]  }
  0x72   : > { %782 = vmatprep.subr.bf16.mxu0 %v781_v8  ;;  %v787_v19 = vpack.c.bf16 %v318_v16, %v317_v15  ;;  %v789_v20 = vpack.c.bf16 %v336_v18, %v335_v17  ;;  %v319_v21 = vld [vmem:[#allocation6 + $0x30] sm:$0xff]  ;;  %v320_v22 = vld [vmem:[#allocation6 + $0x38] sm:$0xff]  ;;  %v337_v23 = vld [vmem:[#allocation6 + $0xc0] sm:$0xff] }
  0x73   : > { %v338_v24 = vld [vmem:[#allocation6 + $0xc8] sm:$0xff]  ;;  %v321_v26 = vld [vmem:[#allocation6 + $0x40] sm:$0xff]  ;;  %v791_v27 = vpack.c.bf16 %v320_v22, %v319_v21  ;;  %v442_v30 = vld [vmem:[#allocation8 + $0x10] sm:$0xff]  ;;  %p1018_p1 = pnand %p1017_p8, %p1432_p12 }
  0x74   : > { %v310_v25 = vld [vmem:[%s1336_s27 + $0x8] sm:$0xff]  ;;  %v440_v28 = vld [vmem:[#allocation8] sm:$0xff]  ;;  %v793_v31 = vpack.c.bf16 %v338_v24, %v337_v23  ;;  %v339_v33 = vld [vmem:[#allocation6 + $0xd0] sm:$0xff] }
  0x75   : > { %784 = vmatpush3.bf16.msra.mxu0 %v783_v13  ;;  %409 = vmatprep.mubr.f32.mxu0 %v310_v25  ;;  %v441_v29 = vld [vmem:[#allocation8 + $0x8] sm:$0xff]  ;;  %v443_v35 = vld [vmem:[#allocation8 + $0x18] sm:$0xff]  ;;  %v444_v38 = vld [vmem:[#allocation8 + $0x20] sm:$0xff]  ;;  %p1019_p10 = pneg %p1018_p1 }
  0x76   : > { %786 = vmatprep.subr.bf16.mxu0 %v785_v14  ;;  %v322_v32 = vld [vmem:[#allocation6 + $0x48] sm:$0xff]  ;;  %v809_v34 = vpack.c.bf16 %v441_v29, %v440_v28  ;;  %v340_v36 = vld [vmem:[#allocation6 + $0xd8] sm:$0xff]  ;;  %v813_v37 = vpack.c.bf16 %v443_v35, %v442_v30  ;;  %v323_v42 = vld [vmem:[#allocation6 + $0x50] sm:$0xff] }
  0x77   : > { %v445_v39 = vld [vmem:[#allocation8 + $0x28] sm:$0xff]  ;;  %v795_v40 = vpack.c.bf16 %v322_v32, %v321_v26  ;;  %v797_v41 = vpack.c.bf16 %v340_v36, %v339_v33  ;;  %v324_v43 = vld [vmem:[#allocation6 + $0x58] sm:$0xff]  ;;  %v341_v44 = vld [vmem:[#allocation6 + $0xe0] sm:$0xff] }
  0x78   : > { %810 = vmatprep.subr.bf16.mxu1 %v809_v34  ;;  %v817_v45 = vpack.c.bf16 %v445_v39, %v444_v38  ;;  %v342_v46 = vld [vmem:[#allocation6 + $0xe8] sm:$0xff]  ;;  %v446_v47 = vld [vmem:[#allocation8 + $0x30] sm:$0xff]  ;;  %v447_v48 = vld [vmem:[#allocation8 + $0x38] sm:$0xff]  ;;  %v799_v49 = vpack.c.bf16 %v324_v43, %v323_v42 }
  0x79   : > { %788 = vmatpush3.bf16.msra.mxu0 %v787_v19  ;;  %812 = vmatpush3.bf16.msra.mxu1 %v809_v34  ;;  %v801_v50 = vpack.c.bf16 %v342_v46, %v341_v44  ;;  %v325_v51 = vld [vmem:[#allocation6 + $0x60] sm:$0xff]  ;;  %v326_v52 = vld [vmem:[#allocation6 + $0x68] sm:$0xff]  ;;  %v343_v53 = vld [vmem:[#allocation6 + $0xf0] sm:$0xff]  ;;  %v821_v54 = vpack.c.bf16 %v447_v48, %v446_v47 }
  0x7a   : > { %790 = vmatprep.subr.bf16.mxu0 %v789_v20  ;;  %814 = vmatprep.subr.bf16.mxu1 %v813_v37  ;;  %v344_v55 = vld [vmem:[#allocation6 + $0xf8] sm:$0xff]  ;;  %v448_v56 = vld [vmem:[#allocation8 + $0x40] sm:$0xff]  ;;  %v449_v57 = vld [vmem:[#allocation8 + $0x48] sm:$0xff]  ;;  %v803_v58 = vpack.c.bf16 %v326_v52, %v325_v51 }
  0x7b   : > { %v805_v59 = vpack.c.bf16 %v344_v55, %v343_v53  ;;  %v327_v60 = vld [vmem:[#allocation6 + $0x70] sm:$0xff]  ;;  %v328_v61 = vld [vmem:[#allocation6 + $0x78] sm:$0xff]  ;;  %v825_v62 = vpack.c.bf16 %v449_v57, %v448_v56  ;;  %v309_v0 = vld [vmem:[%s1336_s27] sm:$0xff] }
  0x7c   : > { %v807_v63 = vpack.c.bf16 %v328_v61, %v327_v60  ;;  %v312_v1 = vld [vmem:[%s1336_s27 + $0x18] sm:$0xff]  ;;  %v311_v2 = vld [vmem:[%s1336_s27 + $0x10] sm:$0xff]  ;;  %v452_v6 = vld [vmem:[#allocation8 + $0x60] sm:$0xff]  ;;  %s1020_s27 = sshll.u32 %s1111_s21, 4  ;;  %s1021_s27 = int_to_ptr.vmem [resolvable:$false] %s1020_s27 }
  0x7d   : > { %792 = vmatpush3.bf16.msra.mxu0 %v791_v27  ;;  %816 = vmatpush3.bf16.msra.mxu1 %v813_v37  ;;  %v450_v3 = vld [vmem:[#allocation8 + $0x50] sm:$0xff]  ;;  %v451_v4 = vld [vmem:[#allocation8 + $0x58] sm:$0xff]  ;;  %v453_v7 = vld [vmem:[#allocation8 + $0x68] sm:$0xff]  ;;  %s1022_s26 = scalar_lea.vmem %s1021_s27, 512  ;;  %p1023_p3 = scmp.lt.s32.totalorder %s1358_s11, %s1021_s27 }
  0x7e   : > { %794 = vmatprep.subr.bf16.mxu0 %v793_v31  ;;  %818 = vmatprep.subr.bf16.mxu1 %v817_v45  ;;  %v829_v5 = vpack.c.bf16 %v451_v4, %v450_v3  ;;  %v833_v8 = vpack.c.bf16 %v453_v7, %v452_v6  ;;  %v454_v9 = vld [vmem:[#allocation8 + $0x70] sm:$0xff]  ;;  %v455_v10 = vld [vmem:[#allocation8 + $0x78] sm:$0xff]  ;;  %v676_v14 = vld [vmem:[%s1414_s2] ss:$0 sm:$0xff]  ;;  %p1024_p5 = scmp.lt.s32.totalorder %s1022_s26, %s1016_s15 }
  0x7f   : > { %v837_v11 = vpack.c.bf16 %v455_v10, %v454_v9  ;;  %v677_v23 = vld [vmem:[%s1416_s4] ss:$0 sm:$0xff] }
  0x80   : > { %p1025_p9 = por %p1024_p5, %p1023_p3 }
  0x81   : > { %796 = vmatpush3.bf16.msra.mxu0 %v795_v40  ;;  %820 = vmatpush3.bf16.msra.mxu1 %v817_v45 }
  0x82   : > { %798 = vmatprep.subr.bf16.mxu0 %v797_v41  ;;  %822 = vmatprep.subr.bf16.mxu1 %v821_v54  ;;  %p1026_p11 = pnand %p1025_p9, %p1019_p10 }
  0x85   : > { %800 = vmatpush3.bf16.msra.mxu0 %v799_v49  ;;  %824 = vmatpush3.bf16.msra.mxu1 %v821_v54 }
  0x86   : > { %802 = vmatprep.subr.bf16.mxu0 %v801_v50  ;;  %826 = vmatprep.subr.bf16.mxu1 %v825_v62 }
  0x89   : > { %804 = vmatpush3.bf16.msra.mxu0 %v803_v58  ;;  %828 = vmatpush3.bf16.msra.mxu1 %v825_v62 }
  0x8a   : > { %806 = vmatprep.subr.bf16.mxu0 %v805_v59  ;;  %830 = vmatprep.subr.bf16.mxu1 %v829_v5 }
  0x8d   : > { %808 = vmatpush3.bf16.msra.mxu0 %v807_v63  ;;  %832 = vmatpush3.bf16.msra.mxu1 %v829_v5 }
  0x8e   : > { %834 = vmatprep.subr.bf16.mxu1 %v833_v8 }
  0x90   : > { %410 = vmatmul.mubr.f32.vlgmr.msra.gmra.mrb[0].mxu0 %v309_v0 }
  0x91   : > { %414 = vmatprep.mubr.f32.mxu0 %v312_v1  ;;  %836 = vmatpush3.bf16.msra.mxu1 %v833_v8 }
  0x92   : > { %838 = vmatprep.subr.bf16.mxu1 %v837_v11 }
  0x94   : > { %415 = vmatmul.mubr.f32.gmra.mrb[2].mxu0 %v311_v2 }
  0x95   : > { %840 = vmatpush3.bf16.msra.mxu1 %v837_v11 }
 0x163   : > { %v718_v12 = vpop.f32.mrb[0].mxu0 }
 0x164   : > { %v719_v13 = vpop.f32.mrb[1].mxu0 }
 0x165   : > { %v720_v15 = vadd.f32 %v719_v13, %v718_v12 }
 0x167   : > { %v721_v16 = vpop.f32.mrb[2].mxu0  ;;  %v436_v17 = vadd.f32 %v720_v15, %v676_v14 }
 0x168   : > { %v722_v18 = vpop.f32.mrb[3].mxu0 }
 0x169   : > { %v723_v19 = vadd.f32 %v722_v18, %v721_v16  ;;  %v438_v20 = vmax.f32 %v436_v17, 0.0 }
 0x16b   : > { %v437_v21 = vadd.f32 %v723_v19, %v676_v14  ;;  %774 = vmatprep.mubr.f32.mxu1 %v438_v20 }
 0x16d   : > { %v439_v22 = vmax.f32 %v437_v21, 0.0 }
 0x16f   : > { %775 = vmatmul.mubr.f32.vlgmr.msra.gmra.mrb[0].mxu1 %v439_v22 }
 0x242   : > { %v776_v24 = vpop.f32.mrb[0].mxu1 }
 0x243   : > { %v535_v25 = vadd.f32 %v776_v24, %v677_v23  ;;  %v529_v26 = vpop.f32.mrb[1].mxu1 }
 0x244   : > { %v530_v27 = vadd.f32 %v677_v23, %v529_v26 }
 0x245   : > { %v539_v28 = vmax.f32 %v535_v25, 0.0 }
 0x246   : > { %v538_v29 = vmax.f32 %v530_v27, 0.0 }
 0x247   : > { %541 = vst [vmem:[%s296_s9 + $0x8] sm:$0xff] %v539_v28 }
 0x248   : > { %540 = vst [vmem:[%s296_s9] sm:$0xff] %v538_v29 }
 0x249   : > { %1029 = shalt.err (!%p1026_p11)
}
 0x24a   : > { %s1030_s28 = scalar_lea.hbm %s1363_s25, 256  ;;  %s1034_s7 = scalar_lea.hbm %s1417_s5, 512 }
 0x24b   : > { %p1031_p0 = scmp.ne.s32.totalorder %s1363_s25, %s1030_s28  ;;  %p1035_p6 = scmp.lt.u32.totalorder %s1363_s25, %s1417_s5 }
 0x24c   : > { %p1036_p7 = scmp.lt.u32.totalorder %s1034_s7, %s1030_s28  ;;  %p1038_p8 = scmp.lt.u32.totalorder %s1030_s28, %s1363_s25 }
 0x24d   : > { %p1032_p4 = pnand %p1031_p0, %p1432_p12 }
 0x24e   : > { %p1037_p2 = por %p1036_p7, %p1035_p6 }
 0x24f   : > { %p1033_p13 = pneg %p1032_p4 }
 0x250   : > { %p1039_p1 = por %p1038_p8, %p1037_p2 }
 0x252   : > { %p1040_p10 = pnand %p1039_p1, %p1033_p13 }
 0x254   : > { %1043 = shalt.err (!%p1040_p10)
}
 0x255   : > { %s1112_s10 = smov 128   ;;  %s1113_s13 = smov 8  }
 0x256   : > { %851 = dma.vmem_to_hbm [thread:$0]  (%p1432_p12), %s1358_s11, 256, %s1363_s25, %s543_s17, %s1112_s10, %s1112_s10, %s1113_s13  }
 0x257 PF: > { %s571_s15 = sand.u32 1, %s1082_s18   ;;  %p1433_p3 = scmp.ne.s32.totalorder %s1425_s29, 0 }
 0x258   : > { %p1434_p5 = scmp.ge.s32.totalorder %s1102_s23, 2  ;;  %s572_s21 = scalar_lea.sflag [#allocation5], %s571_s15 }
 0x25a   : > { %p865_p9 = pnand %p1434_p5, %p1433_p3 }
 0x25c   : > { %1077 = dma.done.wait (!%p865_p9), %s572_s21, 256  }
 0x25d   : > { %1079 = vsyncadd (!%p865_p9), %s572_s21, 4294967040  ;;  %s22_s23 = sadd.s32 1, %s1102_s23   ;;  %s1435_s18 = smov %s1086_s19 }
 0x25e   : > { %p19_p11 = scmp.ge.s32.totalorder %s22_s23, 4   ;;  %s1436_s19 = smov %s1090_s20 }
 0x25f   : > { %s1437_s20 = smov %s1286_s6  ;;  %s1438_s21 = smov %s1098_s22 }
 0x260   : > { %s1439_s22 = smov %s1441_s12  ;;  %21 = sbr.rel (!%p19_p11) target bundleno = 7 (0x7), region = 102 }
 0x267   :  { %577 = vsyncpa [#allocation4], 1 }
 0x268   :  { %579 = vsyncpa [#allocation4 + $0x1], 1 }
 0x269   :  { %580 = vsyncpa [#allocation7], 1 }
 0x26a   :  { %581 = vsyncpa [#allocation5], 1 }
 0x26b   :  { %583 = vsyncpa [#allocation5 + $0x1], 1 }

</bundles_post_ra>
